<compile_context>
chip_gen: v6e
topology: v6e:2x2x1
jax: 0.10.0
libtpu: 0.0.40
codegen_flags: <defaults>
</compile_context>

<pallas_src>
import jax
import jax.numpy as jnp
from jax.experimental import pallas as pl
from jax.experimental.pallas import tpu as pltpu


def _fused_head_kernel(x_ref, w_ref, shift_ref, o_ref, acc_ref):
    # x_ref:     [B, tk]   bf16 flattened-input tile
    # w_ref:     [tk, te]  bf16 fused weight tile (base proj @ head.T, BN scale folded in)
    # shift_ref: [1, te]   f32 folded BN shift (beta - mean*scale)
    # o_ref:     [B, te]   f32 output tile
    # acc_ref:   [B, te]   f32 VMEM accumulator (persists across the k grid axis)
    k = pl.program_id(1)

    @pl.when(k == 0)
    def _():
        acc_ref[...] = jnp.zeros_like(acc_ref)

    acc_ref[...] += jnp.dot(x_ref[...], w_ref[...],
                            preferred_element_type=jnp.float32)

    @pl.when(k == pl.num_programs(1) - 1)
    def _():
        # Dropout(0.5) in eval mode is identity; BN(eval) is the folded affine.
        o_ref[...] = (acc_ref[...] + shift_ref[...]).astype(o_ref.dtype)


def prepare_weights(w_base, w_head, gamma, beta, run_mean, run_var,
                    eps=1e-5, weight_dtype=jnp.bfloat16):
    """One-time weight prep (eval mode, static weights).

    BN eval fold:  scale = gamma / sqrt(var + eps),  shift = beta - mean * scale
    Full fold:     out = x @ (w_base @ (w_head.T * scale)) + shift
    """
    scale = (gamma / jnp.sqrt(run_var + eps)).astype(jnp.float32)          # [E]
    shift = (beta - run_mean * scale).astype(jnp.float32)                  # [E]
    w_fused = (w_base.astype(jnp.float32)
               @ (w_head.T.astype(jnp.float32) * scale[None, :]))          # [CHW, E]
    return w_fused.astype(weight_dtype), shift.reshape(1, -1)


def _pick_tile(dim, target, quantum=128):
    """Largest multiple-of-`quantum` divisor of `dim` that is <= target (else full dim)."""
    if dim <= target:
        return dim
    t = (target // quantum) * quantum
    while t > quantum and dim % t:
        t -= quantum
    return t if (t > 0 and dim % t == 0) else dim


def model_with_head_forward(x_nchw, w_fused, shift, *, tk=512, te=128,
                            compute_dtype=jnp.bfloat16):
    """x_nchw: [B, C, H, W].  w_fused: [C*H*W, E].  shift: [1, E].  Returns [B, E] f32."""
    B = x_nchw.shape[0]
    x_flat = x_nchw.reshape(B, -1).astype(compute_dtype)                   # glue: flatten NCHW
    CHW, E = w_fused.shape
    assert x_flat.shape[1] == CHW and shift.shape == (1, E)

    tk = _pick_tile(CHW, tk)      # contraction tile (pipelined weight stream)
    te = _pick_tile(E, te)        # output-feature tile (parallel axis -> v7x megacore)
    n_k = CHW // tk
    n_e = E // te

    flops = 2 * B * CHW * E
    bytes_accessed = (x_flat.size * x_flat.dtype.itemsize * n_e
                      + w_fused.size * w_fused.dtype.itemsize
                      + shift.size * shift.dtype.itemsize
                      + B * E * 4)

    out = pl.pallas_call(
        _fused_head_kernel,
        out_shape=jax.ShapeDtypeStruct((B, E), jnp.float32),
        grid_spec=pltpu.PrefetchScalarGridSpec(
            num_scalar_prefetch=0,
            grid=(n_e, n_k),                                   # reduction axis (k) last
            in_specs=[
                pl.BlockSpec((B, tk), lambda e, k: (0, k)),    # x tile
                pl.BlockSpec((tk, te), lambda e, k: (k, e)),   # fused weight tile
                pl.BlockSpec((1, te), lambda e, k: (0, e)),    # shift
            ],
            out_specs=pl.BlockSpec((B, te), lambda e, k: (0, e)),
            scratch_shapes=[pltpu.VMEM((B, te), jnp.float32)],
        ),
        compiler_params=pltpu.CompilerParams(
            dimension_semantics=("parallel", "arbitrary")),
        cost_estimate=pl.CostEstimate(flops=flops, transcendentals=0,
                                      bytes_accessed=bytes_accessed),
    )(x_flat, w_fused.astype(compute_dtype), shift.astype(jnp.float32))
    return out


if __name__ == "__main__":
    # Small shapes consistent with the module (input_dim / embedding_size scaled down).
    B, C, H, W = 8, 4, 16, 16          # image input to base_model (NCHW)
    INPUT_DIM = 256                    # base_model embed_dim (scaled-down 768)
    EMBEDDING_SIZE = 128               # scaled-down 512
    CHW = C * H * W

    key = jax.random.PRNGKey(0)
    k_x, k_wb, k_wh, k_g, k_b, k_m, k_v = jax.random.split(key, 7)

    x = jax.random.normal(k_x, (B, C, H, W), dtype=jnp.float32)

    # Deterministic parameter init (synthetic; no checkpoint load).
    w_base = jax.random.normal(k_wb, (CHW, INPUT_DIM), dtype=jnp.float32) * 0.02
    w_head = jax.random.normal(k_wh, (EMBEDDING_SIZE, INPUT_DIM), dtype=jnp.float32) * 0.02
    gamma = 1.0 + 0.1 * jax.random.normal(k_g, (EMBEDDING_SIZE,), dtype=jnp.float32)
    beta = 0.1 * jax.random.normal(k_b, (EMBEDDING_SIZE,), dtype=jnp.float32)
    run_mean = 0.05 * jax.random.normal(k_m, (EMBEDDING_SIZE,), dtype=jnp.float32)
    run_var = jnp.abs(jax.random.normal(k_v, (EMBEDDING_SIZE,), dtype=jnp.float32)) + 0.5

    # One-time weight fusion (eval mode), then the Pallas forward.
    w_fused, shift = prepare_weights(w_base, w_head, gamma, beta, run_mean, run_var)
    out = model_with_head_forward(x, w_fused, shift)
    jax.block_until_ready(out)
    assert out.shape == (B, EMBEDDING_SIZE)

    # Reference 1: original module semantics in full f32 (loose tol due to bf16 weights/acts).
    feats_ref = x.reshape(B, -1) @ w_base
    emb_ref = feats_ref @ w_head.T
    ref_f32 = (emb_ref - run_mean) / jnp.sqrt(run_var + 1e-5) * gamma + beta
    err_f32 = float(jnp.max(jnp.abs(out - ref_f32)))
    assert jnp.allclose(out, ref_f32, atol=5e-2, rtol=5e-2), err_f32

    # Reference 2: same bf16-rounded fused operands, f32 math (tight tol on the kernel itself).
    ref_bf16 = (x.reshape(B, -1).astype(jnp.bfloat16).astype(jnp.float32)
                @ w_fused.astype(jnp.float32) + shift)
    err_bf16 = float(jnp.max(jnp.abs(out - ref_bf16)))
    assert jnp.allclose(out, ref_bf16, atol=1e-3, rtol=1e-3), err_bf16

    print("KERNEL_OK")
</pallas_src>

<mosaic_0001>
module attributes {stable_mosaic.version = 11 : i64} {
  func.func @_fused_head_kernel(%arg0: i32, %arg1: i32, %arg2: memref<8x512xbf16, #tpu.memory_space<vmem>>, %arg3: memref<512x128xbf16, #tpu.memory_space<vmem>>, %arg4: memref<1x128xf32, #tpu.memory_space<vmem>>, %arg5: memref<8x128xf32, #tpu.memory_space<vmem>>, %arg6: memref<8x128xf32, #tpu.memory_space<vmem>>) attributes {dimension_semantics = [#tpu.dimension_semantics<parallel>, #tpu.dimension_semantics<arbitrary>], iteration_bounds = array<i64: 1, 2>, scalar_prefetch = 0 : i64, scratch_operands = 1 : i64, tpu.core_type = #tpu.core_type<tc>, window_params = [{transform_indices = @transform_0, window_bounds = array<i64: 8, 512>}, {transform_indices = @transform_1, window_bounds = array<i64: 512, 128>}, {transform_indices = @transform_2, window_bounds = array<i64: 1, 128>}, {transform_indices = @transform_3, window_bounds = array<i64: 8, 128>}]} {
    %c0_i32 = arith.constant 0 : i32
    %0 = arith.cmpi eq, %arg1, %c0_i32 : i32
    %1 = arith.extui %0 : i1 to i32
    %c0_i32_0 = arith.constant 0 : i32
    %2 = arith.cmpi ne, %1, %c0_i32_0 : i32
    scf.if %2 {
      %cst_9 = arith.constant 0.000000e+00 : f32
      %12 = vector.broadcast %cst_9 : f32 to vector<8x128xf32>
      %c0_10 = arith.constant 0 : index
      %c0_11 = arith.constant 0 : index
      %13 = vector.load %arg6[%c0_10, %c0_11] : memref<8x128xf32, #tpu.memory_space<vmem>>, vector<8x128xf32>
      tpu.vector_store %arg6[%c0_10, %c0_11], %12 {strides = array<i32>} : memref<8x128xf32, #tpu.memory_space<vmem>>, vector<8x128xf32>,
    } else {
    }
    %c0 = arith.constant 0 : index
    %c0_1 = arith.constant 0 : index
    %3 = vector.load %arg6[%c0, %c0_1] : memref<8x128xf32, #tpu.memory_space<vmem>>, vector<8x128xf32>
    %c0_2 = arith.constant 0 : index
    %c0_3 = arith.constant 0 : index
    %4 = vector.load %arg2[%c0_2, %c0_3] : memref<8x512xbf16, #tpu.memory_space<vmem>>, vector<8x512xbf16>
    %c0_4 = arith.constant 0 : index
    %c0_5 = arith.constant 0 : index
    %5 = vector.load %arg3[%c0_4, %c0_5] : memref<512x128xbf16, #tpu.memory_space<vmem>>, vector<512x128xbf16>
    %cst = arith.constant dense<0.000000e+00> : vector<8x128xf32>
    %6 = tpu.matmul %4, %5, %cst {dimension_numbers = #tpu.dot_dimension_numbers<[1], [0], [0], [1], [0, 0, 1, 1], [], []>} : vector<8x512xbf16>, vector<512x128xbf16>, vector<8x128xf32> -> vector<8x128xf32>
    %7 = arith.addf %3, %6 : vector<8x128xf32>
    %c0_6 = arith.constant 0 : index
    %c0_7 = arith.constant 0 : index
    %8 = vector.load %arg6[%c0_6, %c0_7] : memref<8x128xf32, #tpu.memory_space<vmem>>, vector<8x128xf32>
    tpu.vector_store %arg6[%c0_6, %c0_7], %7 {strides = array<i32>} : memref<8x128xf32, #tpu.memory_space<vmem>>, vector<8x128xf32>,
    %c1_i32 = arith.constant 1 : i32
    %9 = arith.cmpi eq, %arg1, %c1_i32 : i32
    %10 = arith.extui %9 : i1 to i32
    %c0_i32_8 = arith.constant 0 : i32
    %11 = arith.cmpi ne, %10, %c0_i32_8 : i32
    scf.if %11 {
      %c0_9 = arith.constant 0 : index
      %c0_10 = arith.constant 0 : index
      %12 = vector.load %arg6[%c0_9, %c0_10] : memref<8x128xf32, #tpu.memory_space<vmem>>, vector<8x128xf32>
      %c0_11 = arith.constant 0 : index
      %c0_12 = arith.constant 0 : index
      %13 = vector.load %arg4[%c0_11, %c0_12] : memref<1x128xf32, #tpu.memory_space<vmem>>, vector<1x128xf32>
      %14 = vector.broadcast %13 : vector<1x128xf32> to vector<8x128xf32>
      %15 = arith.addf %12, %14 : vector<8x128xf32>
      %c0_13 = arith.constant 0 : index
      %c0_14 = arith.constant 0 : index
      %16 = vector.load %arg5[%c0_13, %c0_14] : memref<8x128xf32, #tpu.memory_space<vmem>>, vector<8x128xf32>
      tpu.vector_store %arg5[%c0_13, %c0_14], %15 {strides = array<i32>} : memref<8x128xf32, #tpu.memory_space<vmem>>, vector<8x128xf32>,
    } else {
    }
    return
  }
  func.func @transform_0(%arg0: i32, %arg1: i32) -> (i32, i32) {
    %c0_i32 = arith.constant 0 : i32
    %c0_i32_0 = arith.constant 0 : i32
    return %c0_i32, %arg1 : i32, i32
  }
  func.func @transform_1(%arg0: i32, %arg1: i32) -> (i32, i32) {
    %c0_i32 = arith.constant 0 : i32
    return %arg1, %arg0 : i32, i32
  }
  func.func @transform_2(%arg0: i32, %arg1: i32) -> (i32, i32) {
    %c0_i32 = arith.constant 0 : i32
    %c0_i32_0 = arith.constant 0 : i32
    return %c0_i32, %arg0 : i32, i32
  }
  func.func @transform_3(%arg0: i32, %arg1: i32) -> (i32, i32) {
    %c0_i32 = arith.constant 0 : i32
    %c0_i32_0 = arith.constant 0 : i32
    return %c0_i32, %arg0 : i32, i32
  }
}

</mosaic_0001>

<bundles_post_ra>
// kernel: tpu_custom_call.1
= control target key start
LH: loop header
LB: loop body
LE: loop exit
PB: predicated region body
PF: predicated region fallthrough
CT: control target
= control target key end

     0   :  { %8 = vsyncpa [#allocation4], 0  ;;  %s1292_s0 = inlined_call_operand.hbm [shape: bf16[8,1024], index: 0, kind: input, shape index: {}]   ;;  %s1293_s1 = inlined_call_operand.hbm [shape: bf16[1024,128], index: 1, kind: input, shape index: {}]   ;;  %s1294_s2 = inlined_call_operand.vmem [shape: f32[1,128], index: 2, kind: input, shape index: {}]   ;;  %s1295_s3 = inlined_call_operand.hbm [shape: f32[8,128], index: 3, kind: output, shape index: {}]  }
   0x1   :  { %10 = vsyncpa [#allocation4 + $0x1], 0 }
   0x2   :  { %11 = vsyncpa [#allocation7], 0 }
   0x3   :  { %13 = vsyncpa [#allocation7 + $0x1], 0 }
   0x4   :  { %14 = vsyncpa [#allocation5], 0  ;;  %s1107_s12 = smov 0   ;;  %s1109_s13 = smov 0  }
   0x5   :  { %s1111_s14 = smov 0   ;;  %s1113_s15 = smov 0  }
   0x6   :  { %s1115_s16 = smov 0   ;;  %s1117_s17 = smov 0  }
   0x7 LB: > { %s733_s18 = sadd.s32 4294967295, %s1079_s17   ;;  %s29_s19 = sadd.s32 1, %s1075_s16  ;;  %s1079_s17 = sphi %s1117_s17, %s20_s17   ;;  %s1075_s16 = sphi %s1115_s16, %s1305_s16   ;;  %s1071_s15 = sphi %s1113_s15, %s1304_s15   ;;  %s1067_s14 = sphi %s1111_s14, %s1303_s14   ;;  %s1063_s13 = sphi %s1109_s13, %s1302_s13   ;;  %s1059_s12 = sphi %s1107_s12, %s1301_s12  }
   0x8   : > { %p30_p0 = scmp.ge.s32.totalorder %s29_s19, 2  ;;  %s39_s20 = sadd.s32 1, %s1067_s14 }
   0x9   : > { %p46_p1 = scmp.ne.s32.totalorder %s1067_s14, %s1063_s13  ;;  %p47_p2 = scmp.eq.s32.totalorder %s1079_s17, 0 }
   0xa   : > { %s1307_s19 = smov (%p30_p0, %s29_s19), 0  ;;  %p52_p4 = scmp.ne.s32.totalorder %s1063_s13, %s1059_s12 }
   0xb   : > { %p1143_p3 = por %p47_p2, %p46_p1  ;;  %s36_s22 = ssub.s32 %s1075_s16, %s1307_s19 }
   0xc   : > { %p53_p5 = scmp.eq.s32.totalorder %s733_s18, 0  ;;  %p37_p6 = scmp.eq.s32.totalorder %s36_s22, 0 }
   0xd   : > { %p850_p8 = scmp.lt.s32.totalorder %s1079_s17, 2  ;;  %s1161_s25 = sand.u32 1, %s1067_s14  }
   0xe   : > { %p1152_p7 = por %p53_p5, %p52_p4  ;;  %s789_s26 = sshll.u32 %s1075_s16, 8 }
   0xf   : > { %s1158_s24 = scalar_select %p37_p6, %s1067_s14, %s39_s20  }
  0x10   : > { %s737_s27 = sshll.u32 %s1161_s25, 4  ;;  %s172_s30 = scalar_lea.hbm %s1292_s0, %s789_s26 }
  0x11   : > { %s166_s4 = scalar_lea.vmem [#allocation3], %s737_s27  ;;  %p1170_p9 = pnand %p850_p8, %p1143_p3 }
  0x12   : > { %s174_s5 = sshll.u32 %s166_s4, 4  ;;  %p743_p10 = scmp.ge.s32.totalorder %s1079_s17, 1  ;;  %s175_s5 = int_to_ptr.vmem [resolvable:$true] %s174_s5 }
  0x13   : > { %p201_p11 = scmp.lt.s32.totalorder %s1079_s17, 3  ;;  %s163_s7 = scalar_lea.sflag [#allocation4], %s1161_s25 }
  0x14   : > { %p943_p12 = pneg %p1170_p9  ;;  %s954_s8 = scalar_lea.vmem %s175_s5, 256 }
  0x15   : > { %p955_p13 = scmp.ne.s32.totalorder %s175_s5, %s954_s8  ;;  %s1081_s9 = smov [#allocation3]  }
  0x16   : > { %s959_s10 = sshll.u32 %s1081_s9, 4  ;;  %s960_s10 = int_to_ptr.vmem [resolvable:$false] %s959_s10 }
  0x17   : > { %p957_p0 = pnand %p955_p13, %p943_p12  ;;  %s961_s11 = scalar_lea.vmem %s960_s10, 512 }
  0x18   : > { %p962_p2 = scmp.lt.s32.totalorder %s175_s5, %s960_s10  ;;  %p963_p3 = scmp.lt.s32.totalorder %s961_s11, %s954_s8 }
  0x19   : > { %p958_p1 = pneg %p957_p0 }
  0x1a   : > { %p964_p4 = por %p963_p3, %p962_p2 }
  0x1c   : > { %p965_p5 = pnand %p964_p4, %p958_p1 }
  0x1e   : > { %968 = shalt.err (!%p965_p5)
}
  0x1f   : > { %846 = dma.hbm_to_vmem [thread:$0]  (!%p1170_p9), %s172_s30, 256, %s175_s5, %s163_s7  }
  0x20   : > { %p1188_p6 = pnand %p743_p10, %p201_p11  ;;  %s740_s20 = sshll.u32 %s1161_s25, 8 }
  0x21   : > { %s790_s21 = sshll.u32 %s1075_s16, 12  ;;  %s185_s28 = scalar_lea.vmem [#allocation6], %s740_s20 }
  0x22   : > { %s192_s27 = scalar_lea.hbm %s1293_s1, %s790_s21  ;;  %s193_s29 = sshll.u32 %s185_s28, 4  ;;  %s194_s29 = int_to_ptr.vmem [resolvable:$true] %s193_s29 }
  0x23   : > { %s182_s4 = scalar_lea.sflag [#allocation7], %s1161_s25  ;;  %s982_s8 = scalar_lea.vmem %s194_s29, 4096 }
  0x24   : > { %p983_p8 = scmp.ne.s32.totalorder %s194_s29, %s982_s8  ;;  %s1082_s30 = smov [#allocation6]  }
  0x25   : > { %s987_s5 = sshll.u32 %s1082_s30, 4  ;;  %s988_s5 = int_to_ptr.vmem [resolvable:$false] %s987_s5 }
  0x26   : > { %p985_p13 = pnand %p983_p8, %p943_p12  ;;  %s989_s7 = scalar_lea.vmem %s988_s5, 8192 }
  0x27   : > { %p990_p10 = scmp.lt.s32.totalorder %s194_s29, %s988_s5  ;;  %p991_p11 = scmp.lt.s32.totalorder %s989_s7, %s982_s8 }
  0x28   : > { %p986_p0 = pneg %p985_p13 }
  0x29   : > { %p992_p1 = por %p991_p11, %p990_p10 }
  0x2b   : > { %p993_p2 = pnand %p992_p1, %p986_p0 }
  0x2d   : > { %996 = shalt.err (!%p993_p2)
}
  0x2e   : > { %s1083_s9 = smov 64   ;;  %s1084_s10 = smov 4  }
  0x2f   : > { %849 = dma.hbm_to_vmem [thread:$0]  (!%p1170_p9), %s192_s27, 4096, %s194_s29, %s182_s4, %s1083_s9, %s1083_s9, %s1084_s10  }
  0x30   : > { %205 = sbr.rel (%p1188_p6) target bundleno = 328 (0x148), region = 32  ;;  %s207_s25 = sand.u32 (!%p1188_p6), 1, %s1063_s13  }
  0x31   : > { %s744_s11 = sshll.u32 (!%p1188_p6), %s207_s25, 4  ;;  %s208_s20 = scalar_lea.sflag (!%p1188_p6), [#allocation4], %s207_s25 }
  0x32   : > { %s1206_s21 = scalar_lea.vmem (!%p1188_p6), [#allocation3], %s744_s11 }
  0x35   : > { %1046 = dma.done.wait (%p1152_p7), %s208_s20, 256  }
  0x36   : > { %1048 = vsyncadd (%p1152_p7), %s208_s20, 4294967040  ;;  %s745_s22 = sshll.u32 %s207_s25, 8  ;;  %s217_s26 = scalar_lea.sflag [#allocation7], %s207_s25 }
  0x37   : > { %s1212_s6 = scalar_lea.vmem [#allocation6], %s745_s22 }
  0x38   : > { %1050 = dma.done.wait (%p1152_p7), %s217_s26, 4096  }
  0x39   : > { %1052 = vsyncadd (%p1152_p7), %s217_s26, 4294963200  ;;  %p746_p9 = scmp.ne.s32.totalorder %s1071_s15, 0 }
  0x3b   : > { %255 = sbr.rel (%p746_p9) target bundleno = 66 (0x42), region = 44 }
  0x40   : > { %v1085_v0 = vmov 0.0  }
  0x41   : > { %256 = vst [vmem:[#allocation2] sm:$0xff] %v1085_v0 }
  0x42 PF: > { %v905_v1 = vld [vmem:[%s1212_s6 + $0x78] sm:$0xff]   ;;  %v909_v5 = vld [vmem:[%s1212_s6 + $0x70] sm:$0xff]   ;;  %v913_v9 = vld [vmem:[%s1212_s6 + $0x68] sm:$0xff]   ;;  %p783_p7 = scmp.ne.s32.totalorder %s1071_s15, 1 }
  0x43   : > { %v906_v2 = vld [vmem:[%s1212_s6 + $0xf8] sm:$0xff]   ;;  %791 = vmatprep.subr.bf16.mxu0 %v905_v1  ;;  %v910_v6 = vld [vmem:[%s1212_s6 + $0xf0] sm:$0xff]   ;;  %v914_v10 = vld [vmem:[%s1212_s6 + $0xe8] sm:$0xff]  }
  0x44   : > { %v907_v3 = vld [vmem:[%s1212_s6 + $0x38] sm:$0xff]   ;;  %813 = vmatprep.subr.bf16.mxu1 %v906_v2  ;;  %v911_v7 = vld [vmem:[%s1212_s6 + $0x30] sm:$0xff]   ;;  %v915_v11 = vld [vmem:[%s1212_s6 + $0x28] sm:$0xff]  }
  0x45   : > { %v908_v4 = vld [vmem:[%s1212_s6 + $0xb8] sm:$0xff]   ;;  %792 = vmatpush3.bf16.msra.mxu0 %v907_v3  ;;  %v912_v8 = vld [vmem:[%s1212_s6 + $0xb0] sm:$0xff]   ;;  %v916_v12 = vld [vmem:[%s1212_s6 + $0xa8] sm:$0xff]  }
  0x46   : > { %814 = vmatpush3.bf16.msra.mxu1 %v908_v4  ;;  %793 = vmatprep.subr.bf16.mxu0 %v909_v5  ;;  %v917_v13 = vld [vmem:[%s1212_s6 + $0x60] sm:$0xff]   ;;  %v921_v17 = vld [vmem:[%s1212_s6 + $0x58] sm:$0xff]   ;;  %v925_v21 = vld [vmem:[%s1212_s6 + $0x50] sm:$0xff]  }
  0x47   : > { %815 = vmatprep.subr.bf16.mxu1 %v910_v6  ;;  %v918_v14 = vld [vmem:[%s1212_s6 + $0xe0] sm:$0xff]   ;;  %v922_v18 = vld [vmem:[%s1212_s6 + $0xd8] sm:$0xff]   ;;  %v926_v22 = vld [vmem:[%s1212_s6 + $0xd0] sm:$0xff]  }
  0x48   : > { %v919_v15 = vld [vmem:[%s1212_s6 + $0x20] sm:$0xff]   ;;  %v923_v19 = vld [vmem:[%s1212_s6 + $0x18] sm:$0xff]   ;;  %v927_v23 = vld [vmem:[%s1212_s6 + $0x10] sm:$0xff]  }
  0x49   : > { %794 = vmatpush3.bf16.msra.mxu0 %v911_v7  ;;  %v920_v16 = vld [vmem:[%s1212_s6 + $0xa0] sm:$0xff]   ;;  %v924_v20 = vld [vmem:[%s1212_s6 + $0x98] sm:$0xff]   ;;  %v928_v24 = vld [vmem:[%s1212_s6 + $0x90] sm:$0xff]  }
  0x4a   : > { %816 = vmatpush3.bf16.msra.mxu1 %v912_v8  ;;  %795 = vmatprep.subr.bf16.mxu0 %v913_v9  ;;  %v929_v25 = vld [vmem:[%s1212_s6 + $0x48] sm:$0xff]   ;;  %v933_v29 = vld [vmem:[%s1212_s6 + $0x40] sm:$0xff]   ;;  %v257_v45 = vld [vmem:[#allocation2] sm:$0xff] }
  0x4b   : > { %817 = vmatprep.subr.bf16.mxu1 %v914_v10  ;;  %v930_v26 = vld [vmem:[%s1212_s6 + $0xc8] sm:$0xff]   ;;  %v934_v30 = vld [vmem:[%s1212_s6 + $0xc0] sm:$0xff]  }
  0x4c   : > { %v931_v27 = vld [vmem:[%s1212_s6 + $0x8] sm:$0xff]   ;;  %v935_v31 = vld [vmem:[%s1212_s6] sm:$0xff]  }
  0x4d   : > { %796 = vmatpush3.bf16.msra.mxu0 %v915_v11  ;;  %v932_v28 = vld [vmem:[%s1212_s6 + $0x88] sm:$0xff]   ;;  %v936_v32 = vld [vmem:[%s1212_s6 + $0x80] sm:$0xff]  }
  0x4e   : > { %818 = vmatpush3.bf16.msra.mxu1 %v916_v12  ;;  %797 = vmatprep.subr.bf16.mxu0 %v917_v13  ;;  %v258_v33 = vld [vmem:[%s1206_s21] sm:$0xff]  ;;  %v259_v34 = vld [vmem:[%s1206_s21 + $0x8] sm:$0xff] }
  0x4f   : > { %819 = vmatprep.subr.bf16.mxu1 %v918_v14  ;;  %v747_v35 = vcombine.low %v258_v33, %v258_v33  ;;  %v748_v36 = vcombine.high %v258_v33, %v258_v33  ;;  %v749_v37 = vcombine.low %v259_v34, %v259_v34  ;;  %v750_v38 = vcombine.high %v259_v34, %v259_v34 }
  0x51   : > { %798 = vmatpush3.bf16.msra.mxu0 %v919_v15  ;;  %562 = vmatprep.mubr.bf16.mxu0 %v748_v36 }
  0x52   : > { %820 = vmatpush3.bf16.msra.mxu1 %v920_v16  ;;  %799 = vmatprep.subr.bf16.mxu0 %v921_v17 }
  0x53   : > { %821 = vmatprep.subr.bf16.mxu1 %v922_v18  ;;  %602 = vmatprep.mubr.bf16.mxu1 %v750_v38 }
  0x55   : > { %800 = vmatpush3.bf16.msra.mxu0 %v923_v19 }
  0x56   : > { %822 = vmatpush3.bf16.msra.mxu1 %v924_v20  ;;  %801 = vmatprep.subr.bf16.mxu0 %v925_v21 }
  0x57   : > { %823 = vmatprep.subr.bf16.mxu1 %v926_v22 }
  0x59   : > { %802 = vmatpush3.bf16.msra.mxu0 %v927_v23 }
  0x5a   : > { %824 = vmatpush3.bf16.msra.mxu1 %v928_v24  ;;  %803 = vmatprep.subr.bf16.mxu0 %v929_v25 }
  0x5b   : > { %825 = vmatprep.subr.bf16.mxu1 %v930_v26 }
  0x5d   : > { %804 = vmatpush3.bf16.msra.mxu0 %v931_v27 }
  0x5e   : > { %826 = vmatpush3.bf16.msra.mxu1 %v932_v28  ;;  %805 = vmatprep.subr.bf16.mxu0 %v933_v29 }
  0x5f   : > { %827 = vmatprep.subr.bf16.mxu1 %v934_v30 }
  0x61   : > { %806 = vmatpush3.bf16.msra.mxu0 %v935_v31 }
  0x62   : > { %828 = vmatpush3.bf16.msra.mxu1 %v936_v32 }
  0x64   : > { %563 = vmatmul.mubr.bf16.vlgmr.msra.gmra.mxu0 %v747_v35 }
  0x65   : > { %603 = vmatmul.mubr.bf16.vlgmr.msra.gmra.mxu1 %v749_v37 }
 0x124   : > { %v807_v39 = vpop.f32.mrf.mxu0 }
 0x125   : > { %v829_v40 = vpop.f32.mrf.mxu1 }
 0x126   : > { %v808_v41 = vpop.f32.mrf.mxu0 }
 0x127   : > { %v830_v42 = vpop.f32.mrf.mxu1  ;;  %v809_v43 = vadd.f32 %v808_v41, %v807_v39 }
 0x128   : > { %v831_v44 = vadd.f32 %v830_v42, %v829_v40  ;;  %v810_v46 = vpop.f32.mrf.mxu0 }
 0x129   : > { %v832_v47 = vpop.f32.mrf.mxu1 }
 0x12a   : > { %v605_v48 = vadd.f32 %v831_v44, %v809_v43  ;;  %v811_v49 = vpop.f32.mrf.mxu0  ;;  %615 = sbr.rel (%p783_p7) target bundleno = 313 (0x139), region = 48 }
 0x12b   : > { %v833_v50 = vpop.f32.mrf.mxu1 }
 0x12c   : > { %v610_v51 = vadd.f32 %v605_v48, %v257_v45 }
 0x12e   : > { %611 = vst [vmem:[#allocation2] sm:$0xff] %v610_v51 }
 0x12f   : > { %v784_v53 = vld [vmem:[%s1294_s2] ss:$0 sm:$0xff] }
 0x135   : > { %v616_v52 = vld [vmem:[#allocation2] sm:$0xff] }
 0x136   : > { %v624_v54 = vadd.f32 %v784_v53, %v616_v52 }
 0x138   : > { %625 = vst [vmem:[#allocation8] sm:$0xff] %v624_v54 }
 0x139 PF: > { %p1259_p12 = scmp.eq.s32.totalorder %s733_s18, 1  ;;  %s1086_s28 = smov [#allocation8]  }
 0x13a   : > { %s635_s29 = sshll.u32 %s1086_s28, 4  ;;  %s636_s29 = int_to_ptr.vmem [resolvable:$true] %s635_s29 }
 0x13b   : > { %s997_s15 = scalar_lea.vmem %s636_s29, 128  ;;  %p1004_p6 = scmp.lt.s32.totalorder %s636_s29, %s636_s29 }
 0x13c   : > { %p998_p3 = scmp.ne.s32.totalorder %s636_s29, %s997_s15  ;;  %p1005_p8 = scmp.lt.s32.totalorder %s997_s15, %s997_s15 }
 0x13e   : > { %p999_p4 = pnand %p998_p3, %p1259_p12  ;;  %p1006_p13 = por %p1005_p8, %p1004_p6 }
 0x140   : > { %p1000_p5 = pneg %p999_p4 }
 0x142   : > { %p1007_p0 = pnand %p1006_p13, %p1000_p5 }
 0x144   : > { %1010 = shalt.err (!%p1007_p0)
}
 0x145   : > { %840 = dma.vmem_to_hbm [thread:$0]  (%p1259_p12), %s636_s29, 128, %s1295_s3, [#allocation5]  }
 0x146   : > { %1054 = dma.done.wait (%p1259_p12), [#allocation5], 128  }
 0x147   : > { %1056 = vsyncadd (%p1259_p12), [#allocation5], 4294967168 }
 0x148 PF: > { %s20_s17 = sadd.s32 1, %s1079_s17   ;;  %s1301_s12 = smov %s1063_s13 }
 0x149   : > { %p17_p10 = scmp.ge.s32.totalorder %s20_s17, 4   ;;  %s1302_s13 = smov %s1067_s14 }
 0x14a   : > { %s1303_s14 = smov %s1158_s24  ;;  %s1304_s15 = smov %s1075_s16 }
 0x14b   : > { %s1305_s16 = smov %s1307_s19  ;;  %19 = sbr.rel (!%p17_p10) target bundleno = 7 (0x7), region = 94 }
 0x150   :  { %648 = vsyncpa [#allocation4], 1 }
 0x151   :  { %650 = vsyncpa [#allocation4 + $0x1], 1 }
 0x152   :  { %651 = vsyncpa [#allocation7], 1 }
 0x153   :  { %653 = vsyncpa [#allocation7 + $0x1], 1 }
 0x154   :  { %654 = vsyncpa [#allocation5], 1 }
 0x155   :  { %656 = vsyncpa [#allocation5 + $0x1], 1 }

</bundles_post_ra>
